<compile_context>
chip_gen: v5e
topology: v5e:2x2
jax: 0.10.0
libtpu: 0.0.40
codegen_flags: <defaults>
</compile_context>

<pallas_src>
import jax
import jax.numpy as jnp
from jax.experimental import pallas as pl
from jax.experimental.pallas import tpu as pltpu


def make_mha_kernel(n_heads, d_k, d_v, dmodel, seq_len, block_b,
                    *, with_attn=True, eps=1e-5):
    scale = 1.0 / (float(d_k) ** 0.5)
    n_rows = block_b * seq_len          # rows fed to the projection matmuls
    inv_d = 1.0 / float(dmodel)

    def kernel(xq_ref, xk_ref, xv_ref, wq_ref, wk_ref, wv_ref, wo_ref,
               o_ref, *maybe_attn):
        attn_ref = maybe_attn[0] if with_attn else None

        # Flatten the (block_b, S, D) slab to (block_b*S, D) so the projections are
        # single large MXU matmuls.
        xq = xq_ref[...].reshape(n_rows, dmodel)
        xk = xk_ref[...].reshape(n_rows, dmodel)
        xv = xv_ref[...].reshape(n_rows, dmodel)

        # Q/K/V projections (MXU).  Fold the 1/sqrt(d_k) scale into Q once.
        q = jnp.dot(xq, wq_ref[...], preferred_element_type=jnp.float32) * scale
        k = jnp.dot(xk, wk_ref[...], preferred_element_type=jnp.float32)
        v = jnp.dot(xv, wv_ref[...], preferred_element_type=jnp.float32)

        q = q.reshape(block_b, seq_len, n_heads * d_k)
        k = k.reshape(block_b, seq_len, n_heads * d_k)
        v = v.reshape(block_b, seq_len, n_heads * d_v)

        # Per-head attention.  Each score/context matmul is a *batched* MXU op over the
        # whole batch tile (contraction on the last dims — no transposes).  The d_k=8
        # contraction width is inherent to this module's head size.
        ctx_heads = []
        for h in range(n_heads):
            qh = q[:, :, h * d_k:(h + 1) * d_k]             # (block_b, S, d_k)
            kh = k[:, :, h * d_k:(h + 1) * d_k]
            vh = v[:, :, h * d_v:(h + 1) * d_v]

            s = jnp.einsum('bqd,bkd->bqk', qh, kh,
                           preferred_element_type=jnp.float32)       # (block_b, S, S)
            s = s - jnp.max(s, axis=-1, keepdims=True)
            e = jnp.exp(s)
            denom = jnp.sum(e, axis=-1, keepdims=True)
            p = e * pl.reciprocal(denom, approx=False)                # softmax(dim=-1)

            if with_attn:
                attn_ref[:, h, :, :] = p.astype(attn_ref.dtype)

            ctx_heads.append(jnp.einsum('bqk,bkd->bqd', p, vh,
                                        preferred_element_type=jnp.float32))

        # Head-major concat along the feature (lane) dim reproduces
        # context.transpose(1, 2).reshape(B, S, H*d_v) from the reference module.
        ctx = jnp.concatenate(ctx_heads, axis=-1).reshape(n_rows, n_heads * d_v)

        # Output projection (single MXU matmul over all heads) + residual.
        acc = xq + jnp.dot(ctx, wo_ref[...], preferred_element_type=jnp.float32)

        # LayerNorm(dmodel), default affine (weight=1, bias=0), biased variance.
        # Single-pass statistics: sum and sum-of-squares from one sweep over `acc`.
        s1 = jnp.sum(acc, axis=-1, keepdims=True)
        s2 = jnp.sum(acc * acc, axis=-1, keepdims=True)
        mean = s1 * inv_d
        var = s2 * inv_d - mean * mean
        y = (acc - mean) * jax.lax.rsqrt(var + eps)

        o_ref[...] = y.reshape(block_b, seq_len, dmodel).astype(o_ref.dtype)

    return kernel


def _pick_block_b(batch, seq_len, target_rows=256):
    """Largest divisor of `batch` such that block_b*S stays near `target_rows` rows."""
    target = max(1, target_rows // max(seq_len, 1))
    for cand in range(min(batch, target), 0, -1):
        if batch % cand == 0:
            return cand
    return 1


def multi_head_attention(input_Q, input_K, input_V, w_q, w_k, w_v, w_fc,
                         *, n_heads, d_k, d_v, block_b=None, return_attn=True):
    B, S, D = input_Q.shape
    assert d_k == D // n_heads and d_v == D // n_heads, \
        "view/reshape in the reference module requires d_k == d_v == dmodel // n_heads"

    if block_b is None:
        # 256-row tiles fill the v6e/v7x MXU nicely; for small B*S this keeps the whole
        # batch in one grid step.
        block_b = _pick_block_b(B, S, target_rows=256)
    assert B % block_b == 0, "block_b must divide the batch size"
    n_btiles = B // block_b

    kernel = make_mha_kernel(n_heads, d_k, d_v, D, S, block_b, with_attn=return_attn)

    weight_spec = pl.BlockSpec((D, D), lambda b: (0, 0))
    in_specs = [
        pl.BlockSpec((block_b, S, D), lambda b: (b, 0, 0)),      # input_Q
        pl.BlockSpec((block_b, S, D), lambda b: (b, 0, 0)),      # input_K
        pl.BlockSpec((block_b, S, D), lambda b: (b, 0, 0)),      # input_V
        weight_spec,                                             # W_Q (in, out)
        weight_spec,                                             # W_K
        weight_spec,                                             # W_V
        pl.BlockSpec((n_heads * d_v, D), lambda b: (0, 0)),      # W_fc (in, out)
    ]

    out_shapes = [jax.ShapeDtypeStruct((B, S, D), jnp.float32)]
    out_specs = [pl.BlockSpec((block_b, S, D), lambda b: (b, 0, 0))]
    if return_attn:
        out_shapes.append(jax.ShapeDtypeStruct((B, n_heads, S, S), jnp.float32))
        out_specs.append(pl.BlockSpec((block_b, n_heads, S, S),
                                      lambda b: (b, 0, 0, 0)))

    # Explicit VMEM budget (double-buffered blocks + weights), kept well under the
    # 64 MiB physical VMEM of a v7x TensorCore.
    blk_bytes = 4 * (4 * block_b * S * D                 # 3 inputs + output block
                     + 4 * D * D                         # weights
                     + (block_b * n_heads * S * S if return_attn else 0))
    vmem_limit = int(min(64 * 1024 * 1024, max(8 * 1024 * 1024, 4 * blk_bytes)))

    outs = pl.pallas_call(
        kernel,
        out_shape=tuple(out_shapes),
        grid_spec=pltpu.PrefetchScalarGridSpec(
            num_scalar_prefetch=0,
            grid=(n_btiles,),
            in_specs=in_specs,
            out_specs=tuple(out_specs),
        ),
        compiler_params=pltpu.CompilerParams(
            dimension_semantics=("parallel",),       # batch tiles shard across TCs
            vmem_limit_bytes=vmem_limit),
    )(input_Q, input_K, input_V, w_q, w_k, w_v, w_fc)

    if return_attn:
        return outs[0], outs[1]
    return outs[0], None


def reference_mha(input_Q, input_K, input_V, w_q, w_k, w_v, w_fc,
                  *, n_heads, d_k, d_v, eps=1e-5):
    """Pure-JAX reference mirroring the PyTorch forward."""
    B, S, D = input_Q.shape

    def split_heads(x, dh):
        return x.reshape(B, S, n_heads, dh).transpose(0, 2, 1, 3)

    Q = split_heads(input_Q @ w_q, d_k)
    K = split_heads(input_K @ w_k, d_k)
    V = split_heads(input_V @ w_v, d_v)
    scores = jnp.einsum('bhqd,bhkd->bhqk', Q, K) / (d_k ** 0.5)
    attn = jax.nn.softmax(scores, axis=-1)
    context = jnp.einsum('bhqk,bhkd->bhqd', attn, V)
    context = context.transpose(0, 2, 1, 3).reshape(B, S, n_heads * d_v)
    out = context @ w_fc + input_Q
    mean = out.mean(-1, keepdims=True)
    var = ((out - mean) ** 2).mean(-1, keepdims=True)
    return (out - mean) / jnp.sqrt(var + eps), attn


if __name__ == "__main__":
    # Small deterministic config: dmodel=32, n_heads=4, d_k=d_v=8, batch=2, seq=8.
    dmodel, n_heads = 32, 4
    d_k = d_v = dmodel // n_heads
    B, S = 2, 8

    key = jax.random.PRNGKey(0)
    k_q, k_k, k_v, k_wq, k_wk, k_wv, k_fc = jax.random.split(key, 7)

    input_Q = jax.random.normal(k_q, (B, S, dmodel), dtype=jnp.float32)
    input_K = jax.random.normal(k_k, (B, S, dmodel), dtype=jnp.float32)
    input_V = jax.random.normal(k_v, (B, S, dmodel), dtype=jnp.float32)

    wscale = 1.0 / (dmodel ** 0.5)
    w_q = jax.random.normal(k_wq, (dmodel, dmodel), dtype=jnp.float32) * wscale
    w_k = jax.random.normal(k_wk, (dmodel, dmodel), dtype=jnp.float32) * wscale
    w_v = jax.random.normal(k_wv, (dmodel, dmodel), dtype=jnp.float32) * wscale
    w_fc = jax.random.normal(k_fc, (n_heads * d_v, dmodel), dtype=jnp.float32) * wscale

    ref_out, ref_attn = reference_mha(
        input_Q, input_K, input_V, w_q, w_k, w_v, w_fc,
        n_heads=n_heads, d_k=d_k, d_v=d_v)

    # 1) Default path (whole batch in one grid step), with attention output.
    out, attn = multi_head_attention(
        input_Q, input_K, input_V, w_q, w_k, w_v, w_fc,
        n_heads=n_heads, d_k=d_k, d_v=d_v)
    jax.block_until_ready((out, attn))
    assert jnp.allclose(out, ref_out, atol=1e-4, rtol=1e-4)
    assert jnp.allclose(attn, ref_attn, atol=1e-5, rtol=1e-5)

    # 2) Multi-step grid (block_b=1) to exercise the batch-tiled pipeline.
    out2, attn2 = multi_head_attention(
        input_Q, input_K, input_V, w_q, w_k, w_v, w_fc,
        n_heads=n_heads, d_k=d_k, d_v=d_v, block_b=1)
    jax.block_until_ready((out2, attn2))
    assert jnp.allclose(out2, ref_out, atol=1e-4, rtol=1e-4)
    assert jnp.allclose(attn2, ref_attn, atol=1e-5, rtol=1e-5)

    # 3) Attention output skipped (memory-side win when probs are not needed).
    out3, _ = multi_head_attention(
        input_Q, input_K, input_V, w_q, w_k, w_v, w_fc,
        n_heads=n_heads, d_k=d_k, d_v=d_v, return_attn=False)
    jax.block_until_ready(out3)
    assert jnp.allclose(out3, ref_out, atol=1e-4, rtol=1e-4)

    print("KERNEL_OK")
</pallas_src>

<mosaic_0001>
module attributes {stable_mosaic.version = 11 : i64} {
  func.func @kernel(%arg0: i32, %arg1: memref<2x8x32xf32, #tpu.memory_space<vmem>>, %arg2: memref<2x8x32xf32, #tpu.memory_space<vmem>>, %arg3: memref<2x8x32xf32, #tpu.memory_space<vmem>>, %arg4: memref<32x32xf32, #tpu.memory_space<vmem>>, %arg5: memref<32x32xf32, #tpu.memory_space<vmem>>, %arg6: memref<32x32xf32, #tpu.memory_space<vmem>>, %arg7: memref<32x32xf32, #tpu.memory_space<vmem>>, %arg8: memref<2x8x32xf32, #tpu.memory_space<vmem>>, %arg9: memref<2x4x8x8xf32, #tpu.memory_space<vmem>>) attributes {dimension_semantics = [#tpu.dimension_semantics<parallel>], iteration_bounds = array<i64: 1>, scalar_prefetch = 0 : i64, scratch_operands = 0 : i64, tpu.core_type = #tpu.core_type<tc>, window_params = [{transform_indices = @transform_0, window_bounds = array<i64: 2, 8, 32>}, {transform_indices = @transform_1, window_bounds = array<i64: 2, 8, 32>}, {transform_indices = @transform_2, window_bounds = array<i64: 2, 8, 32>}, {pipeline_mode = #tpu.pipeline_mode<synchronous>, transform_indices = @transform_3, window_bounds = array<i64: 32, 32>}, {pipeline_mode = #tpu.pipeline_mode<synchronous>, transform_indices = @transform_4, window_bounds = array<i64: 32, 32>}, {pipeline_mode = #tpu.pipeline_mode<synchronous>, transform_indices = @transform_5, window_bounds = array<i64: 32, 32>}, {pipeline_mode = #tpu.pipeline_mode<synchronous>, transform_indices = @transform_6, window_bounds = array<i64: 32, 32>}, {transform_indices = @transform_7, window_bounds = array<i64: 2, 8, 32>}, {transform_indices = @transform_8, window_bounds = array<i64: 2, 4, 8, 8>}]} {
    %c0 = arith.constant 0 : index
    %c0_0 = arith.constant 0 : index
    %c0_1 = arith.constant 0 : index
    %0 = vector.load %arg1[%c0, %c0_0, %c0_1] : memref<2x8x32xf32, #tpu.memory_space<vmem>>, vector<2x8x32xf32>
    %1 = vector.shape_cast %0 : vector<2x8x32xf32> to vector<16x32xf32>
    %c0_2 = arith.constant 0 : index
    %c0_3 = arith.constant 0 : index
    %c0_4 = arith.constant 0 : index
    %2 = vector.load %arg2[%c0_2, %c0_3, %c0_4] : memref<2x8x32xf32, #tpu.memory_space<vmem>>, vector<2x8x32xf32>
    %3 = vector.shape_cast %2 : vector<2x8x32xf32> to vector<16x32xf32>
    %c0_5 = arith.constant 0 : index
    %c0_6 = arith.constant 0 : index
    %c0_7 = arith.constant 0 : index
    %4 = vector.load %arg3[%c0_5, %c0_6, %c0_7] : memref<2x8x32xf32, #tpu.memory_space<vmem>>, vector<2x8x32xf32>
    %5 = vector.shape_cast %4 : vector<2x8x32xf32> to vector<16x32xf32>
    %c0_8 = arith.constant 0 : index
    %c0_9 = arith.constant 0 : index
    %6 = vector.load %arg4[%c0_8, %c0_9] : memref<32x32xf32, #tpu.memory_space<vmem>>, vector<32x32xf32>
    %cst = arith.constant dense<0.000000e+00> : vector<16x32xf32>
    %7 = tpu.matmul %1, %6, %cst {dimension_numbers = #tpu.dot_dimension_numbers<[1], [0], [0], [1], [0, 0, 1, 1], [], []>} : vector<16x32xf32>, vector<32x32xf32>, vector<16x32xf32> -> vector<16x32xf32>
    %cst_10 = arith.constant 0.353553385 : f32
    %8 = vector.broadcast %cst_10 : f32 to vector<16x32xf32>
    %9 = arith.mulf %7, %8 : vector<16x32xf32>
    %c0_11 = arith.constant 0 : index
    %c0_12 = arith.constant 0 : index
    %10 = vector.load %arg5[%c0_11, %c0_12] : memref<32x32xf32, #tpu.memory_space<vmem>>, vector<32x32xf32>
    %cst_13 = arith.constant dense<0.000000e+00> : vector<16x32xf32>
    %11 = tpu.matmul %3, %10, %cst_13 {dimension_numbers = #tpu.dot_dimension_numbers<[1], [0], [0], [1], [0, 0, 1, 1], [], []>} : vector<16x32xf32>, vector<32x32xf32>, vector<16x32xf32> -> vector<16x32xf32>
    %c0_14 = arith.constant 0 : index
    %c0_15 = arith.constant 0 : index
    %12 = vector.load %arg6[%c0_14, %c0_15] : memref<32x32xf32, #tpu.memory_space<vmem>>, vector<32x32xf32>
    %cst_16 = arith.constant dense<0.000000e+00> : vector<16x32xf32>
    %13 = tpu.matmul %5, %12, %cst_16 {dimension_numbers = #tpu.dot_dimension_numbers<[1], [0], [0], [1], [0, 0, 1, 1], [], []>} : vector<16x32xf32>, vector<32x32xf32>, vector<16x32xf32> -> vector<16x32xf32>
    %14 = vector.shape_cast %9 : vector<16x32xf32> to vector<2x8x32xf32>
    %15 = vector.shape_cast %11 : vector<16x32xf32> to vector<2x8x32xf32>
    %16 = vector.shape_cast %13 : vector<16x32xf32> to vector<2x8x32xf32>
    %17 = vector.extract_strided_slice %14 {offsets = [0, 0, 0], sizes = [2, 8, 8], strides = [1, 1, 1]} : vector<2x8x32xf32> to vector<2x8x8xf32>
    %18 = vector.extract_strided_slice %15 {offsets = [0, 0, 0], sizes = [2, 8, 8], strides = [1, 1, 1]} : vector<2x8x32xf32> to vector<2x8x8xf32>
    %19 = vector.extract_strided_slice %16 {offsets = [0, 0, 0], sizes = [2, 8, 8], strides = [1, 1, 1]} : vector<2x8x32xf32> to vector<2x8x8xf32>
    "tpu.trace_start"() <{level = 10 : i32, message = "bqd,bkd->bqk"}> : () -> ()
    %cst_17 = arith.constant dense<0.000000e+00> : vector<2x8x8xf32>
    %20 = tpu.matmul %17, %18, %cst_17 {dimension_numbers = #tpu.dot_dimension_numbers<[2], [2], [1], [1], [0, 0, 0, 1, 1, 1], [0], [0]>} : vector<2x8x8xf32>, vector<2x8x8xf32>, vector<2x8x8xf32> -> vector<2x8x8xf32>
    "tpu.trace_stop"() : () -> ()
    %cst_18 = arith.constant dense<0xFF800000> : vector<2x8xf32>
    %21 = vector.multi_reduction <maximumf>, %20, %cst_18 [2] : vector<2x8x8xf32> to vector<2x8xf32>
    %22 = vector.shape_cast %21 : vector<2x8xf32> to vector<2x8x1xf32>
    %23 = vector.broadcast %22 : vector<2x8x1xf32> to vector<2x8x8xf32>
    %24 = arith.subf %20, %23 : vector<2x8x8xf32>
    %25 = math.exp %24 : vector<2x8x8xf32>
    %cst_19 = arith.constant dense<0.000000e+00> : vector<2x8xf32>
    %26 = vector.multi_reduction <add>, %25, %cst_19 [2] : vector<2x8x8xf32> to vector<2x8xf32>
    %27 = vector.shape_cast %26 : vector<2x8xf32> to vector<2x8x1xf32>
    %28 = tpu.reciprocal %27 : vector<2x8x1xf32> -> vector<2x8x1xf32>
    %29 = vector.broadcast %28 : vector<2x8x1xf32> to vector<2x8x8xf32>
    %30 = arith.mulf %25, %29 : vector<2x8x8xf32>
    %c0_20 = arith.constant 0 : index
    %c0_21 = arith.constant 0 : index
    %c0_22 = arith.constant 0 : index
    %c0_23 = arith.constant 0 : index
    %31 = vector.load %arg9[%c0_20, %c0_21, %c0_22, %c0_23] : memref<2x4x8x8xf32, #tpu.memory_space<vmem>>, vector<2x1x8x8xf32>
    %32 = vector.shape_cast %31 : vector<2x1x8x8xf32> to vector<2x8x8xf32>
    %33 = vector.shape_cast %30 : vector<2x8x8xf32> to vector<2x1x8x8xf32>
    tpu.vector_store %arg9[%c0_20, %c0_21, %c0_22, %c0_23], %33 {strides = array<i32>} : memref<2x4x8x8xf32, #tpu.memory_space<vmem>>, vector<2x1x8x8xf32>,
    "tpu.trace_start"() <{level = 10 : i32, message = "bqk,bkd->bqd"}> : () -> ()
    %cst_24 = arith.constant dense<0.000000e+00> : vector<2x8x8xf32>
    %34 = tpu.matmul %30, %19, %cst_24 {dimension_numbers = #tpu.dot_dimension_numbers<[2], [1], [1], [2], [0, 0, 0, 1, 1, 2], [0], [0]>} : vector<2x8x8xf32>, vector<2x8x8xf32>, vector<2x8x8xf32> -> vector<2x8x8xf32>
    "tpu.trace_stop"() : () -> ()
    %35 = vector.extract_strided_slice %14 {offsets = [0, 0, 8], sizes = [2, 8, 8], strides = [1, 1, 1]} : vector<2x8x32xf32> to vector<2x8x8xf32>
    %36 = vector.extract_strided_slice %15 {offsets = [0, 0, 8], sizes = [2, 8, 8], strides = [1, 1, 1]} : vector<2x8x32xf32> to vector<2x8x8xf32>
    %37 = vector.extract_strided_slice %16 {offsets = [0, 0, 8], sizes = [2, 8, 8], strides = [1, 1, 1]} : vector<2x8x32xf32> to vector<2x8x8xf32>
    "tpu.trace_start"() <{level = 10 : i32, message = "bqd,bkd->bqk"}> : () -> ()
    %cst_25 = arith.constant dense<0.000000e+00> : vector<2x8x8xf32>
    %38 = tpu.matmul %35, %36, %cst_25 {dimension_numbers = #tpu.dot_dimension_numbers<[2], [2], [1], [1], [0, 0, 0, 1, 1, 1], [0], [0]>} : vector<2x8x8xf32>, vector<2x8x8xf32>, vector<2x8x8xf32> -> vector<2x8x8xf32>
    "tpu.trace_stop"() : () -> ()
    %cst_26 = arith.constant dense<0xFF800000> : vector<2x8xf32>
    %39 = vector.multi_reduction <maximumf>, %38, %cst_26 [2] : vector<2x8x8xf32> to vector<2x8xf32>
    %40 = vector.shape_cast %39 : vector<2x8xf32> to vector<2x8x1xf32>
    %41 = vector.broadcast %40 : vector<2x8x1xf32> to vector<2x8x8xf32>
    %42 = arith.subf %38, %41 : vector<2x8x8xf32>
    %43 = math.exp %42 : vector<2x8x8xf32>
    %cst_27 = arith.constant dense<0.000000e+00> : vector<2x8xf32>
    %44 = vector.multi_reduction <add>, %43, %cst_27 [2] : vector<2x8x8xf32> to vector<2x8xf32>
    %45 = vector.shape_cast %44 : vector<2x8xf32> to vector<2x8x1xf32>
    %46 = tpu.reciprocal %45 : vector<2x8x1xf32> -> vector<2x8x1xf32>
    %47 = vector.broadcast %46 : vector<2x8x1xf32> to vector<2x8x8xf32>
    %48 = arith.mulf %43, %47 : vector<2x8x8xf32>
    %c0_28 = arith.constant 0 : index
    %c1 = arith.constant 1 : index
    %c0_29 = arith.constant 0 : index
    %c0_30 = arith.constant 0 : index
    %49 = vector.load %arg9[%c0_28, %c1, %c0_29, %c0_30] : memref<2x4x8x8xf32, #tpu.memory_space<vmem>>, vector<2x1x8x8xf32>
    %50 = vector.shape_cast %49 : vector<2x1x8x8xf32> to vector<2x8x8xf32>
    %51 = vector.shape_cast %48 : vector<2x8x8xf32> to vector<2x1x8x8xf32>
    tpu.vector_store %arg9[%c0_28, %c1, %c0_29, %c0_30], %51 {strides = array<i32>} : memref<2x4x8x8xf32, #tpu.memory_space<vmem>>, vector<2x1x8x8xf32>,
    "tpu.trace_start"() <{level = 10 : i32, message = "bqk,bkd->bqd"}> : () -> ()
    %cst_31 = arith.constant dense<0.000000e+00> : vector<2x8x8xf32>
    %52 = tpu.matmul %48, %37, %cst_31 {dimension_numbers = #tpu.dot_dimension_numbers<[2], [1], [1], [2], [0, 0, 0, 1, 1, 2], [0], [0]>} : vector<2x8x8xf32>, vector<2x8x8xf32>, vector<2x8x8xf32> -> vector<2x8x8xf32>
    "tpu.trace_stop"() : () -> ()
    %53 = vector.extract_strided_slice %14 {offsets = [0, 0, 16], sizes = [2, 8, 8], strides = [1, 1, 1]} : vector<2x8x32xf32> to vector<2x8x8xf32>
    %54 = vector.extract_strided_slice %15 {offsets = [0, 0, 16], sizes = [2, 8, 8], strides = [1, 1, 1]} : vector<2x8x32xf32> to vector<2x8x8xf32>
    %55 = vector.extract_strided_slice %16 {offsets = [0, 0, 16], sizes = [2, 8, 8], strides = [1, 1, 1]} : vector<2x8x32xf32> to vector<2x8x8xf32>
    "tpu.trace_start"() <{level = 10 : i32, message = "bqd,bkd->bqk"}> : () -> ()
    %cst_32 = arith.constant dense<0.000000e+00> : vector<2x8x8xf32>
    %56 = tpu.matmul %53, %54, %cst_32 {dimension_numbers = #tpu.dot_dimension_numbers<[2], [2], [1], [1], [0, 0, 0, 1, 1, 1], [0], [0]>} : vector<2x8x8xf32>, vector<2x8x8xf32>, vector<2x8x8xf32> -> vector<2x8x8xf32>
    "tpu.trace_stop"() : () -> ()
    %cst_33 = arith.constant dense<0xFF800000> : vector<2x8xf32>
    %57 = vector.multi_reduction <maximumf>, %56, %cst_33 [2] : vector<2x8x8xf32> to vector<2x8xf32>
    %58 = vector.shape_cast %57 : vector<2x8xf32> to vector<2x8x1xf32>
    %59 = vector.broadcast %58 : vector<2x8x1xf32> to vector<2x8x8xf32>
    %60 = arith.subf %56, %59 : vector<2x8x8xf32>
    %61 = math.exp %60 : vector<2x8x8xf32>
    %cst_34 = arith.constant dense<0.000000e+00> : vector<2x8xf32>
    %62 = vector.multi_reduction <add>, %61, %cst_34 [2] : vector<2x8x8xf32> to vector<2x8xf32>
    %63 = vector.shape_cast %62 : vector<2x8xf32> to vector<2x8x1xf32>
    %64 = tpu.reciprocal %63 : vector<2x8x1xf32> -> vector<2x8x1xf32>
    %65 = vector.broadcast %64 : vector<2x8x1xf32> to vector<2x8x8xf32>
    %66 = arith.mulf %61, %65 : vector<2x8x8xf32>
    %c0_35 = arith.constant 0 : index
    %c2 = arith.constant 2 : index
    %c0_36 = arith.constant 0 : index
    %c0_37 = arith.constant 0 : index
    %67 = vector.load %arg9[%c0_35, %c2, %c0_36, %c0_37] : memref<2x4x8x8xf32, #tpu.memory_space<vmem>>, vector<2x1x8x8xf32>
    %68 = vector.shape_cast %67 : vector<2x1x8x8xf32> to vector<2x8x8xf32>
    %69 = vector.shape_cast %66 : vector<2x8x8xf32> to vector<2x1x8x8xf32>
    tpu.vector_store %arg9[%c0_35, %c2, %c0_36, %c0_37], %69 {strides = array<i32>} : memref<2x4x8x8xf32, #tpu.memory_space<vmem>>, vector<2x1x8x8xf32>,
    "tpu.trace_start"() <{level = 10 : i32, message = "bqk,bkd->bqd"}> : () -> ()
    %cst_38 = arith.constant dense<0.000000e+00> : vector<2x8x8xf32>
    %70 = tpu.matmul %66, %55, %cst_38 {dimension_numbers = #tpu.dot_dimension_numbers<[2], [1], [1], [2], [0, 0, 0, 1, 1, 2], [0], [0]>} : vector<2x8x8xf32>, vector<2x8x8xf32>, vector<2x8x8xf32> -> vector<2x8x8xf32>
    "tpu.trace_stop"() : () -> ()
    %71 = vector.extract_strided_slice %14 {offsets = [0, 0, 24], sizes = [2, 8, 8], strides = [1, 1, 1]} : vector<2x8x32xf32> to vector<2x8x8xf32>
    %72 = vector.extract_strided_slice %15 {offsets = [0, 0, 24], sizes = [2, 8, 8], strides = [1, 1, 1]} : vector<2x8x32xf32> to vector<2x8x8xf32>
    %73 = vector.extract_strided_slice %16 {offsets = [0, 0, 24], sizes = [2, 8, 8], strides = [1, 1, 1]} : vector<2x8x32xf32> to vector<2x8x8xf32>
    "tpu.trace_start"() <{level = 10 : i32, message = "bqd,bkd->bqk"}> : () -> ()
    %cst_39 = arith.constant dense<0.000000e+00> : vector<2x8x8xf32>
    %74 = tpu.matmul %71, %72, %cst_39 {dimension_numbers = #tpu.dot_dimension_numbers<[2], [2], [1], [1], [0, 0, 0, 1, 1, 1], [0], [0]>} : vector<2x8x8xf32>, vector<2x8x8xf32>, vector<2x8x8xf32> -> vector<2x8x8xf32>
    "tpu.trace_stop"() : () -> ()
    %cst_40 = arith.constant dense<0xFF800000> : vector<2x8xf32>
    %75 = vector.multi_reduction <maximumf>, %74, %cst_40 [2] : vector<2x8x8xf32> to vector<2x8xf32>
    %76 = vector.shape_cast %75 : vector<2x8xf32> to vector<2x8x1xf32>
    %77 = vector.broadcast %76 : vector<2x8x1xf32> to vector<2x8x8xf32>
    %78 = arith.subf %74, %77 : vector<2x8x8xf32>
    %79 = math.exp %78 : vector<2x8x8xf32>
    %cst_41 = arith.constant dense<0.000000e+00> : vector<2x8xf32>
    %80 = vector.multi_reduction <add>, %79, %cst_41 [2] : vector<2x8x8xf32> to vector<2x8xf32>
    %81 = vector.shape_cast %80 : vector<2x8xf32> to vector<2x8x1xf32>
    %82 = tpu.reciprocal %81 : vector<2x8x1xf32> -> vector<2x8x1xf32>
    %83 = vector.broadcast %82 : vector<2x8x1xf32> to vector<2x8x8xf32>
    %84 = arith.mulf %79, %83 : vector<2x8x8xf32>
    %c0_42 = arith.constant 0 : index
    %c3 = arith.constant 3 : index
    %c0_43 = arith.constant 0 : index
    %c0_44 = arith.constant 0 : index
    %85 = vector.load %arg9[%c0_42, %c3, %c0_43, %c0_44] : memref<2x4x8x8xf32, #tpu.memory_space<vmem>>, vector<2x1x8x8xf32>
    %86 = vector.shape_cast %85 : vector<2x1x8x8xf32> to vector<2x8x8xf32>
    %87 = vector.shape_cast %84 : vector<2x8x8xf32> to vector<2x1x8x8xf32>
    tpu.vector_store %arg9[%c0_42, %c3, %c0_43, %c0_44], %87 {strides = array<i32>} : memref<2x4x8x8xf32, #tpu.memory_space<vmem>>, vector<2x1x8x8xf32>,
    "tpu.trace_start"() <{level = 10 : i32, message = "bqk,bkd->bqd"}> : () -> ()
    %cst_45 = arith.constant dense<0.000000e+00> : vector<2x8x8xf32>
    %88 = tpu.matmul %84, %73, %cst_45 {dimension_numbers = #tpu.dot_dimension_numbers<[2], [1], [1], [2], [0, 0, 0, 1, 1, 2], [0], [0]>} : vector<2x8x8xf32>, vector<2x8x8xf32>, vector<2x8x8xf32> -> vector<2x8x8xf32>
    "tpu.trace_stop"() : () -> ()
    %89 = tpu.concatenate %34, %52, %70, %88 in 2 : vector<2x8x8xf32>, vector<2x8x8xf32>, vector<2x8x8xf32>, vector<2x8x8xf32> -> vector<2x8x32xf32>
    %90 = vector.shape_cast %89 : vector<2x8x32xf32> to vector<16x32xf32>
    %c0_46 = arith.constant 0 : index
    %c0_47 = arith.constant 0 : index
    %91 = vector.load %arg7[%c0_46, %c0_47] : memref<32x32xf32, #tpu.memory_space<vmem>>, vector<32x32xf32>
    %cst_48 = arith.constant dense<0.000000e+00> : vector<16x32xf32>
    %92 = tpu.matmul %90, %91, %cst_48 {dimension_numbers = #tpu.dot_dimension_numbers<[1], [0], [0], [1], [0, 0, 1, 1], [], []>} : vector<16x32xf32>, vector<32x32xf32>, vector<16x32xf32> -> vector<16x32xf32>
    %93 = arith.addf %1, %92 : vector<16x32xf32>
    %cst_49 = arith.constant dense<0.000000e+00> : vector<16xf32>
    %94 = vector.multi_reduction <add>, %93, %cst_49 [1] : vector<16x32xf32> to vector<16xf32>
    %95 = vector.shape_cast %94 : vector<16xf32> to vector<16x1xf32>
    %96 = arith.mulf %93, %93 : vector<16x32xf32>
    %cst_50 = arith.constant dense<0.000000e+00> : vector<16xf32>
    %97 = vector.multi_reduction <add>, %96, %cst_50 [1] : vector<16x32xf32> to vector<16xf32>
    %98 = vector.shape_cast %97 : vector<16xf32> to vector<16x1xf32>
    %cst_51 = arith.constant 3.125000e-02 : f32
    %99 = vector.broadcast %cst_51 : f32 to vector<16x1xf32>
    %100 = arith.mulf %95, %99 : vector<16x1xf32>
    %cst_52 = arith.constant 3.125000e-02 : f32
    %101 = vector.broadcast %cst_52 : f32 to vector<16x1xf32>
    %102 = arith.mulf %98, %101 : vector<16x1xf32>
    %103 = arith.mulf %100, %100 : vector<16x1xf32>
    %104 = arith.subf %102, %103 : vector<16x1xf32>
    %105 = vector.broadcast %100 : vector<16x1xf32> to vector<16x32xf32>
    %106 = arith.subf %93, %105 : vector<16x32xf32>
    %cst_53 = arith.constant 9.99999974E-6 : f32
    %107 = vector.broadcast %cst_53 : f32 to vector<16x1xf32>
    %108 = arith.addf %104, %107 : vector<16x1xf32>
    %109 = math.rsqrt %108 : vector<16x1xf32>
    %110 = vector.broadcast %109 : vector<16x1xf32> to vector<16x32xf32>
    %111 = arith.mulf %106, %110 : vector<16x32xf32>
    %112 = vector.shape_cast %111 : vector<16x32xf32> to vector<2x8x32xf32>
    %c0_54 = arith.constant 0 : index
    %c0_55 = arith.constant 0 : index
    %c0_56 = arith.constant 0 : index
    %113 = vector.load %arg8[%c0_54, %c0_55, %c0_56] : memref<2x8x32xf32, #tpu.memory_space<vmem>>, vector<2x8x32xf32>
    tpu.vector_store %arg8[%c0_54, %c0_55, %c0_56], %112 {strides = array<i32>} : memref<2x8x32xf32, #tpu.memory_space<vmem>>, vector<2x8x32xf32>,
    return
  }
  func.func @transform_0(%arg0: i32) -> (i32, i32, i32) {
    %c0_i32 = arith.constant 0 : i32
    %c0_i32_0 = arith.constant 0 : i32
    %c0_i32_1 = arith.constant 0 : i32
    return %arg0, %c0_i32, %c0_i32_0 : i32, i32, i32
  }
  func.func @transform_1(%arg0: i32) -> (i32, i32, i32) {
    %c0_i32 = arith.constant 0 : i32
    %c0_i32_0 = arith.constant 0 : i32
    %c0_i32_1 = arith.constant 0 : i32
    return %arg0, %c0_i32, %c0_i32_0 : i32, i32, i32
  }
  func.func @transform_2(%arg0: i32) -> (i32, i32, i32) {
    %c0_i32 = arith.constant 0 : i32
    %c0_i32_0 = arith.constant 0 : i32
    %c0_i32_1 = arith.constant 0 : i32
    return %arg0, %c0_i32, %c0_i32_0 : i32, i32, i32
  }
  func.func @transform_3(%arg0: i32) -> (i32, i32) {
    %c0_i32 = arith.constant 0 : i32
    %c0_i32_0 = arith.constant 0 : i32
    %c0_i32_1 = arith.constant 0 : i32
    return %c0_i32, %c0_i32_0 : i32, i32
  }
  func.func @transform_4(%arg0: i32) -> (i32, i32) {
    %c0_i32 = arith.constant 0 : i32
    %c0_i32_0 = arith.constant 0 : i32
    %c0_i32_1 = arith.constant 0 : i32
    return %c0_i32, %c0_i32_0 : i32, i32
  }
  func.func @transform_5(%arg0: i32) -> (i32, i32) {
    %c0_i32 = arith.constant 0 : i32
    %c0_i32_0 = arith.constant 0 : i32
    %c0_i32_1 = arith.constant 0 : i32
    return %c0_i32, %c0_i32_0 : i32, i32
  }
  func.func @transform_6(%arg0: i32) -> (i32, i32) {
    %c0_i32 = arith.constant 0 : i32
    %c0_i32_0 = arith.constant 0 : i32
    %c0_i32_1 = arith.constant 0 : i32
    return %c0_i32, %c0_i32_0 : i32, i32
  }
  func.func @transform_7(%arg0: i32) -> (i32, i32, i32) {
    %c0_i32 = arith.constant 0 : i32
    %c0_i32_0 = arith.constant 0 : i32
    %c0_i32_1 = arith.constant 0 : i32
    return %arg0, %c0_i32, %c0_i32_0 : i32, i32, i32
  }
  func.func @transform_8(%arg0: i32) -> (i32, i32, i32, i32) {
    %c0_i32 = arith.constant 0 : i32
    %c0_i32_0 = arith.constant 0 : i32
    %c0_i32_1 = arith.constant 0 : i32
    %c0_i32_2 = arith.constant 0 : i32
    return %arg0, %c0_i32, %c0_i32_0, %c0_i32_1 : i32, i32, i32, i32
  }
}

</mosaic_0001>

<bundles_post_ra>
// kernel: tpu_custom_call.1
= control target key start
LH: loop header
LB: loop body
LE: loop exit
PB: predicated region body
PF: predicated region fallthrough
CT: control target
= control target key end

     0   :  { %14 = vsyncpa [#allocation3], 0  ;;  %s1606_s0 = inlined_call_operand.hbm [shape: f32[2,8,32], index: 0, kind: input, shape index: {}]   ;;  %s1607_s1 = inlined_call_operand.hbm [shape: f32[2,8,32], index: 1, kind: input, shape index: {}]   ;;  %s1608_s2 = inlined_call_operand.hbm [shape: f32[2,8,32], index: 2, kind: input, shape index: {}]   ;;  %s1609_s3 = inlined_call_operand.hbm [shape: f32[32,32], index: 3, kind: input, shape index: {}]   ;;  %s1610_s4 = inlined_call_operand.hbm [shape: f32[32,32], index: 4, kind: input, shape index: {}]   ;;  %s1611_s5 = inlined_call_operand.hbm [shape: f32[32,32], index: 5, kind: input, shape index: {}]   ;;  %s1612_s6 = inlined_call_operand.hbm [shape: f32[32,32], index: 6, kind: input, shape index: {}]   ;;  %s1613_s7 = inlined_call_operand.hbm [shape: f32[2,8,32], index: 7, kind: output, shape index: {0}]   ;;  %s1614_s8 = inlined_call_operand.hbm [shape: f32[2,4,8,8], index: 8, kind: output, shape index: {1}]  }
   0x1   :  { %15 = vsyncpa [#allocation6], 0 }
   0x2   :  { %16 = vsyncpa [#allocation9], 0 }
   0x3   :  { %17 = vsyncpa [#allocation12], 0 }
   0x4   :  { %18 = vsyncpa [#allocation4], 0 }
   0x5   :  { %19 = vsyncpa [#allocation16], 0  ;;  %s37_s29 = sshll.u32 %s1607_s1, 4  ;;  %s1348_s30 = smov [#allocation5]   ;;  %s38_s29 = int_to_ptr.hbm [resolvable:$true] %s37_s29 }
   0x6   :  { %s39_s9 = sshll.u32 %s1348_s30, 4  ;;  %s63_s12 = sshll.u32 %s1609_s3, 4  ;;  %s40_s9 = int_to_ptr.vmem [resolvable:$true] %s39_s9  ;;  %s64_s12 = int_to_ptr.hbm [resolvable:$true] %s63_s12 }
   0x7   :  { %s1349_s13 = smov 128   ;;  %s1350_s14 = smov 8  }
   0x8   :  { %45 = dma.hbm_to_vmem [thread:$0]  %s38_s29, 256, %s40_s9, [#allocation6], %s1349_s13, %s1349_s13, %s1350_s14  }
   0x9   :  { %s1351_s15 = smov [#allocation8]   ;;  %s89_s1 = sshll.u32 %s1611_s5, 4  ;;  %s90_s1 = int_to_ptr.hbm [resolvable:$true] %s89_s1 }
   0xa   :  { %s65_s16 = sshll.u32 %s1351_s15, 4  ;;  %s24_s20 = sshll.u32 %s1606_s0, 4  ;;  %s66_s16 = int_to_ptr.vmem [resolvable:$true] %s65_s16  ;;  %s25_s20 = int_to_ptr.hbm [resolvable:$true] %s24_s20 }
   0xb   :  { %71 = dma.hbm_to_vmem [thread:$0]  %s64_s12, 512, %s66_s16, [#allocation9], %s1349_s13, %s1349_s13, %s1350_s14  }
   0xc   :  { %s1352_s21 = smov [#allocation11]   ;;  %s1353_s23 = smov [#allocation2]  }
   0xd   :  { %s91_s22 = sshll.u32 %s1352_s21, 4  ;;  %s26_s5 = sshll.u32 %s1353_s23, 4  ;;  %s92_s22 = int_to_ptr.vmem [resolvable:$true] %s91_s22  ;;  %s27_s5 = int_to_ptr.vmem [resolvable:$true] %s26_s5 }
   0xe   :  { %97 = dma.hbm_to_vmem [thread:$0]  %s90_s1, 512, %s92_s22, [#allocation12], %s1349_s13, %s1349_s13, %s1350_s14  }
   0xf   :  { %s50_s26 = sshll.u32 %s1608_s2, 4  ;;  %s76_s28 = sshll.u32 %s1610_s4, 4  ;;  %s51_s26 = int_to_ptr.hbm [resolvable:$true] %s50_s26  ;;  %s77_s28 = int_to_ptr.hbm [resolvable:$true] %s76_s28 }
  0x10   :  { %32 = dma.hbm_to_vmem [thread:$0]  %s25_s20, 256, %s27_s5, [#allocation3], %s1349_s13, %s1349_s13, %s1350_s14  }
  0x11   :  { %s1354_s29 = smov [#allocation7]   ;;  %s1355_s9 = smov [#allocation10]  }
  0x12   :  { %s52_s30 = sshll.u32 %s1354_s29, 4  ;;  %s78_s2 = sshll.u32 %s1355_s9, 4  ;;  %s53_s30 = int_to_ptr.vmem [resolvable:$true] %s52_s30  ;;  %s79_s2 = int_to_ptr.vmem [resolvable:$true] %s78_s2 }
  0x13   :  { %58 = dma.hbm_to_vmem [thread:$0]  %s51_s26, 256, %s53_s30, [#allocation6], %s1349_s13, %s1349_s13, %s1350_s14  }
  0x14   :  { %s102_s12 = sshll.u32 %s1612_s6, 4  ;;  %s1356_s4 = smov [#allocation13]   ;;  %s103_s12 = int_to_ptr.hbm [resolvable:$true] %s102_s12 }
  0x15   :  { %84 = dma.hbm_to_vmem [thread:$0]  %s77_s28, 512, %s79_s2, [#allocation9], %s1349_s13, %s1349_s13, %s1350_s14  }
  0x16   :  { %s104_s15 = sshll.u32 %s1356_s4, 4  ;;  %s105_s15 = int_to_ptr.vmem [resolvable:$true] %s104_s15 }
  0x17   :  { %110 = dma.hbm_to_vmem [thread:$0]  %s103_s12, 512, %s105_s15, [#allocation12], %s1349_s13, %s1349_s13, %s1350_s14  }
  0x18   :  { %1336 = dma.done.wait [#allocation3], 256  }
  0x19   :  { %1337 = vsyncadd [#allocation3], 4294967040 }
  0x1a   :  { %1338 = dma.done.wait [#allocation6], 512  }
  0x1b   :  { %1339 = vsyncadd [#allocation6], 4294966784 }
  0x1c   :  { %1340 = dma.done.wait [#allocation9], 1024  }
  0x1d   :  { %1341 = vsyncadd [#allocation9], 4294966272 }
  0x1e   :  { %1342 = dma.done.wait [#allocation12], 1024  }
  0x1f   :  { %1343 = vsyncadd [#allocation12], 4294966272  ;;  %v148_v0 = vld [vmem:[#allocation8 + $0x18] sm:$0xff]  ;;  %v147_v2 = vld [vmem:[#allocation8 + $0x10] sm:$0xff]  ;;  %vm149_vm0 = vcmask 261120   ;;  %vm247_vm1 = vcmask 64512  }
  0x20   :  { %v184_v1 = vld [vmem:[#allocation10 + $0x18] sm:$0xff]  ;;  %168 = vmatpush.msra.mxu0 %v148_v0  ;;  %v183_v3 = vld [vmem:[#allocation10 + $0x10] sm:$0xff]  ;;  %v146_v4 = vld [vmem:[#allocation8 + $0x8] sm:$0xff]  ;;  %s1357_s6 = smov 112   ;;  %s1358_s16 = smov 120  }
  0x21   :  { %203 = vmatpush.msra.mxu1 %v184_v1  ;;  %1064 = vmatpush.msra.mxu2 %v184_v1  ;;  %v182_v5 = vld [vmem:[#allocation10 + $0x8] sm:$0xff]  ;;  %v145_v6 = vld [vmem:[#allocation8] sm:$0xff]  ;;  %v1451_v8 = vld [vmem:[#allocation2] sm:$0xff]  ;;  %s1359_s17 = smov 104   ;;  %s1360_s18 = smov 16  }
  0x22   :  { %169 = vmatpush.msra.mxu0 %v147_v2  ;;  %v181_v7 = vld [vmem:[#allocation10] sm:$0xff]  ;;  %v142_v10 = vld [vmem:[#allocation5 + $0x8] sm:$0xff]  ;;  %v1457_v11 = vld [vmem:[#allocation2 + $0x8] sm:$0xff]  ;;  %s1361_s1 = smov 24   ;;  %s1362_s3 = smov [#allocation15]  }
  0x23   :  { %204 = vmatpush.msra.mxu1 %v183_v3  ;;  %1065 = vmatpush.msra.mxu2 %v183_v3  ;;  %v141_v9 = vld [vmem:[#allocation5] sm:$0xff]  ;;  %v217_v18 = vld [vmem:[#allocation11 + $0x18] sm:$0xff]  ;;  %v216_v19 = vld [vmem:[#allocation11 + $0x10] sm:$0xff]  ;;  %s1009_s19 = sshll.u32 %s1362_s3, 4  ;;  %s1011_s22 = sshll.u32 %s1614_s8, 4  ;;  %s1010_s19 = int_to_ptr.vmem [resolvable:$true] %s1009_s19  ;;  %s1012_s22 = int_to_ptr.hbm [resolvable:$true] %s1011_s22 }
  0x24   :  { %170 = vmatpush.msra.mxu0 %v146_v4  ;;  %v215_v20 = vld [vmem:[#allocation11 + $0x8] sm:$0xff]  ;;  %v214_v21 = vld [vmem:[#allocation11] sm:$0xff]  ;;  %v143_v22 = vld [vmem:[#allocation7] sm:$0xff]  ;;  %s1363_s8 = smov [#allocation14]   ;;  %s998_s25 = sshll.u32 %s1613_s7, 4  ;;  %s999_s25 = int_to_ptr.hbm [resolvable:$true] %s998_s25 }
  0x25   :  { %205 = vmatpush.msra.mxu1 %v182_v5  ;;  %1066 = vmatpush.msra.mxu2 %v182_v5  ;;  %v144_v23 = vld [vmem:[#allocation7 + $0x8] sm:$0xff]  ;;  %s996_s23 = sshll.u32 %s1363_s8, 4  ;;  %s997_s23 = int_to_ptr.vmem [resolvable:$true] %s996_s23 }
  0x26   :  { %171 = vmatpush.msra.mxu0 %v145_v6 }
  0x27   :  { %206 = vmatpush.msra.mxu1 %v181_v7  ;;  %1032 = vmatmul.msk.f32.vlgmr.msra.gmra.mxu0 %vm149_vm0, %v1451_v8 }
  0x28   :  { %1034 = vmatmul.msk.f32.vlgmr.msra.gmra.mxu1 %vm149_vm0, %v141_v9  ;;  %1067 = vmatpush.msra.mxu2 %v181_v7 }
  0x29   :  { %1035 = vmatmul.msk.f32.vlgmr.msra.gmra.mxu2 %vm149_vm0, %v142_v10 }
  0x2a   :  { %236 = vmatpush.msrb.mxu2 %v217_v18 }
  0x2c   :  { %237 = vmatpush.msrb.mxu2 %v216_v19 }
  0x2e   :  { %238 = vmatpush.msrb.mxu2 %v215_v20 }
  0x2f   :  { %1033 = vmatmul.msk.f32.gmra.mxu0 %vm149_vm0, %v1457_v11 }
  0x30   :  { %239 = vmatpush.msrb.mxu2 %v214_v21 }
  0x31   :  { %1036 = vmatmul.msk.f32.vlgmr.msrb.gmra.mxu2 %vm149_vm0, %v143_v22 }
  0x39   :  { %1037 = vmatmul.msk.f32.gmra.mxu2 %vm149_vm0, %v144_v23 }
  0xa4   :  { %v173_v12 = vpop.f32.mrf.mxu0 }
  0xa5   :  { %v208_v13 = vpop.f32.mrf.mxu1  ;;  %v179_v14 = vmul.f32 0.35355338, %v173_v12 }
  0xa6   :  { %559 = vrot.lane.b32.xlu1 %v208_v13, %s1357_s6  ;;  %398 = vrot.lane.b32.xlu0 %v208_v13, %s1358_s16 }
  0xa7   :  { %1038 = vmatpush.xpose.msk.msra.mxu3 %vm247_vm1, %v208_v13  ;;  %557 = vrot.lane.b32.xlu2 %v179_v14, %s1357_s6 }
  0xaa   :  { %1039 = vmatmul.msk.f32.vlgmr.msra.gmra.mxu3 %vm247_vm1, %v179_v14 }
  0xac   :  { %v176_v15 = vpop.f32.mrf.mxu0  ;;  %v211_v16 = vpop.f32.mrf.mxu2 }
  0xad   :  { %v180_v17 = vmul.f32 0.35355338, %v176_v15  ;;  %1040 = vmatpush.xpose.msk.msrb.mxu3 %vm247_vm1, %v211_v16 }
  0xae   :  { %426 = vrot.lane.b32.xlu1 %v211_v16, %s1358_s16  ;;  %396 = vrot.lane.b32.xlu0 %v179_v14, %s1358_s16 }
  0xaf   :  { %424 = vrot.lane.b32.xlu2 %v180_v17, %s1358_s16 }
  0xb2   :  { %1041 = vmatmul.msk.f32.vlgmr.msrb.gmra.mxu3 %vm247_vm1, %v180_v17 }
  0xb4   :  { %v1493_v40 = vpop.f32.mrf.mxu2 }
  0xb5   :  { %368 = vmatpush.msra.mxu3 %v1493_v40 }
  0xb6   :  { %718 = vrot.lane.b32.xlu1 %v208_v13, %s1359_s17  ;;  %587 = vrot.lane.b32.xlu0 %v211_v16, %s1357_s6 }
  0xb7   :  { %585 = vrot.lane.b32.xlu2 %v180_v17, %s1357_s6 }
  0xbc   :  { %v1496_v41 = vpop.f32.mrf.mxu2 }
  0xbd   :  { %391 = vmatpush.msrb.mxu0 %v1496_v41 }
  0xbe   :  { %746 = vrot.lane.b32.xlu1 %v211_v16, %s1359_s17  ;;  %716 = vrot.lane.b32.xlu0 %v179_v14, %s1359_s17 }
  0xbf   :  { %744 = vrot.lane.b32.xlu2 %v180_v17, %s1359_s17 }
 0x101   :  { %v558_v24 = vpop.permute.xlu2 %557 }
 0x109   :  { %v425_v27 = vpop.permute.xlu2 %424 }
 0x111   :  { %v586_v32 = vpop.permute.xlu2 %585 }
 0x118   :  { %v560_v25 = vpop.permute.xlu1 %559  ;;  %v399_v26 = vpop.permute.xlu0 %398 }
 0x119   :  { %1044 = vmatpush.xpose.msk.msrb.mxu1 %vm247_vm1, %v399_v26  ;;  %v745_v37 = vpop.permute.xlu2 %744 }
 0x11d   :  { %1050 = vmatpush.xpose.msk.msra.mxu1 %vm247_vm1, %v560_v25 }
 0x120   :  { %v427_v28 = vpop.permute.xlu1 %426  ;;  %v397_v29 = vpop.permute.xlu0 %396 }
 0x121   :  { %1046 = vmatpush.xpose.msk.msra.mxu2 %vm247_vm1, %v427_v28  ;;  %1045 = vmatmul.msk.f32.vlgmr.msrb.gmra.mxu1 %vm247_vm1, %v397_v29 }
 0x124   :  { %1047 = vmatmul.msk.f32.vlgmr.msra.gmra.mxu2 %vm247_vm1, %v425_v27 }
 0x128   :  { %v719_v30 = vpop.permute.xlu1 %718  ;;  %v588_v31 = vpop.permute.xlu0 %587 }
 0x129   :  { %1056 = vmatpush.xpose.msk.msrb.mxu1 %vm247_vm1, %v719_v30  ;;  %1052 = vmatpush.xpose.msk.msrb.mxu2 %vm247_vm1, %v588_v31 }
 0x12a   :  { %1051 = vmatmul.msk.f32.vlgmr.msra.gmra.mxu1 %vm247_vm1, %v558_v24 }
 0x12c   :  { %1053 = vmatmul.msk.f32.vlgmr.msrb.gmra.mxu2 %vm247_vm1, %v586_v32 }
 0x12d   :  { %v271_v33 = vpop.f32.mrf.mxu3 }
 0x12e   :  { %v300_v34 = vsel %vm247_vm1, %v271_v33, -inf }
 0x12f   :  { %301 = vmax.xlane.f32.xlu0 %v300_v34 }
 0x130   :  { %v747_v35 = vpop.permute.xlu1 %746  ;;  %v717_v36 = vpop.permute.xlu0 %716 }
 0x131   :  { %1058 = vmatpush.xpose.msk.msra.mxu2 %vm247_vm1, %v747_v35 }
 0x132   :  { %1057 = vmatmul.msk.f32.vlgmr.msrb.gmra.mxu1 %vm247_vm1, %v717_v36 }
 0x134   :  { %1059 = vmatmul.msk.f32.vlgmr.msra.gmra.mxu2 %vm247_vm1, %v745_v37 }
 0x135   :  { %v297_v38 = vpop.f32.mrf.mxu3 }
 0x136   :  { %v303_v39 = vsel %vm247_vm1, %v297_v38, -inf }
 0x137   :  { %304 = vmax.xlane.f32.xlu2 %v303_v39 }
 0x19e   :  { %v421_v42 = vpop.f32.mrf.mxu1 }
 0x19f   :  { %v452_v43 = vsel %vm247_vm1, %v421_v42, -inf }
 0x1a0   :  { %453 = vmax.xlane.f32.xlu1 %v452_v43 }
 0x1a2   :  { %v302_v59 = vpop.xlane.xlu0 %301 }
 0x1a3   :  { %v306_v60 = vsub.f32 %v271_v33, %v302_v59 }
 0x1a5   :  { %v308_v61 = vmul.f32 1.442695, %v306_v60 }
 0x1a7   :  { %v582_v44 = vpop.f32.mrf.mxu1  ;;  %v449_v45 = vpop.f32.mrf.mxu2 }
 0x1a8   :  { %v613_v46 = vsel %vm247_vm1, %v582_v44, -inf  ;;  %v455_v47 = vsel %vm247_vm1, %v449_v45, -inf }
 0x1a9   :  { %614 = vmax.xlane.f32.xlu2 %v613_v46  ;;  %456 = vmax.xlane.f32.xlu0 %v455_v47 }
 0x1aa   :  { %v305_v48 = vpop.xlane.xlu2 %304 }
 0x1ab   :  { %v307_v49 = vsub.f32 %v297_v38, %v305_v48 }
 0x1ad   :  { %v310_v50 = vmul.f32 1.442695, %v307_v49 }
 0x1af   :  { %1084 = vpow2.f32 %v310_v50  ;;  %v741_v51 = vpop.f32.mrf.mxu1  ;;  %v610_v52 = vpop.f32.mrf.mxu2 }
 0x1b0   :  { %v772_v53 = vsel %vm247_vm1, %v741_v51, -inf  ;;  %v616_v54 = vsel %vm247_vm1, %v610_v52, -inf  ;;  %1086 = vpow2.f32 %v308_v61 }
 0x1b1   :  { %773 = vmax.xlane.f32.xlu1 %v772_v53  ;;  %617 = vmax.xlane.f32.xlu2 %v616_v54 }
 0x1b5   :  { %v1504_v55 = vpop.eup %1084 }
 0x1b6   :  { %v315_v56 = vsel %vm247_vm1, %v1504_v55, 0.0  ;;  %v1513_v62 = vpop.eup %1086 }
 0x1b7   :  { %316 = vadd.xlane.f32.xlu0 %v315_v56  ;;  %v769_v57 = vpop.f32.mrf.mxu2  ;;  %v312_v63 = vsel %vm247_vm1, %v1513_v62, 0.0 }
 0x1b8   :  { %v775_v58 = vsel %vm247_vm1, %v769_v57, -inf }
 0x1bf   :  { %776 = vmax.xlane.f32.xlu0 %v775_v58 }
 0x1ca   :  { %504 = vrot.lane.b32.xlu1 %v1493_v40, %s1358_s16 }
 0x1d3   :  { %664 = vrot.lane.b32.xlu0 %v1493_v40, %s1357_s6 }
 0x1f4   :  { %313 = vadd.xlane.f32.xlu1 %v312_v63 }
 0x213   :  { %v454_v0 = vpop.xlane.xlu1 %453 }
 0x214   :  { %v458_v1 = vsub.f32 %v421_v42, %v454_v0 }
 0x216   :  { %v460_v2 = vmul.f32 1.442695, %v458_v1 }
 0x218   :  { %1088 = vpow2.f32 %v460_v2 }
 0x21c   :  { %v615_v3 = vpop.xlane.xlu2 %614  ;;  %v457_v4 = vpop.xlane.xlu0 %456 }
 0x21d   :  { %v619_v5 = vsub.f32 %v582_v44, %v615_v3  ;;  %v459_v6 = vsub.f32 %v449_v45, %v457_v4 }
 0x21e   :  { %v1517_v7 = vpop.eup %1088 }
 0x21f   :  { %v621_v9 = vmul.f32 1.442695, %v619_v5  ;;  %v462_v10 = vmul.f32 1.442695, %v459_v6  ;;  %v464_v12 = vsel %vm247_vm1, %v1517_v7, 0.0 }
 0x220   :  { %465 = vadd.xlane.f32.xlu2 %v464_v12 }
 0x221   :  { %1090 = vpow2.f32 %v621_v9 }
 0x222   :  { %1092 = vpow2.f32 %v462_v10 }
 0x224   :  { %v774_v13 = vpop.xlane.xlu1 %773  ;;  %v618_v15 = vpop.xlane.xlu2 %617 }
 0x225   :  { %v778_v14 = vsub.f32 %v741_v51, %v774_v13  ;;  %v620_v16 = vsub.f32 %v610_v52, %v618_v15 }
 0x227   :  { %v1521_v17 = vpop.eup %1090  ;;  %v780_v18 = vmul.f32 1.442695, %v778_v14  ;;  %v623_v20 = vmul.f32 1.442695, %v620_v16 }
 0x228   :  { %v1523_v19 = vpop.eup %1092  ;;  %v625_v21 = vsel %vm247_vm1, %v1521_v17, 0.0 }
 0x229   :  { %1094 = vpow2.f32 %v780_v18  ;;  %626 = vadd.xlane.f32.xlu1 %v625_v21  ;;  %v467_v22 = vsel %vm247_vm1, %v1523_v19, 0.0 }
 0x22a   :  { %1096 = vpow2.f32 %v623_v20  ;;  %468 = vadd.xlane.f32.xlu2 %v467_v22  ;;  %v317_v23 = vpop.xlane.xlu0 %316 }
 0x22b   :  { %1098 = vrcp.f32 %v317_v23  ;;  %v343_v33 = vand.u32 2147483648, %v317_v23  ;;  %v341_v36 = vand.u32 2147483647, %v317_v23  ;;  %vm337_vm3 = vweird.f32 %v317_v23 }
 0x22d   :  { %v344_v38 = vor.u32 1.1754944e-38, %v343_v33  ;;  %vm342_vm5 = vcmp.eq.f32.partialorder %v341_v36, 8.507059e+37 }
 0x22f   :  { %v1529_v24 = vpop.eup %1094 }
 0x230   :  { %v1531_v25 = vpop.eup %1096  ;;  %v784_v26 = vsel %vm247_vm1, %v1529_v24, 0.0 }
 0x231   :  { %v1099_v27 = vpop.eup %1098  ;;  %785 = vadd.xlane.f32.xlu0 %v784_v26  ;;  %v628_v28 = vsel %vm247_vm1, %v1531_v25, 0.0 }
 0x232   :  { %v333_v29 = vmul.f32 %v1099_v27, %v317_v23  ;;  %v777_v30 = vpop.xlane.xlu0 %776  ;;  %629 = vadd.xlane.f32.xlu2 %v628_v28  ;;  %vm338_vm2 = vweird.f32 %v1099_v27 }
 0x233   :  { %v779_v31 = vsub.f32 %v769_v57, %v777_v30  ;;  %vm339_vm4 = vmor %vm337_vm3, %vm338_vm2 }
 0x234   :  { %v334_v32 = vsub.f32 1.0, %v333_v29 }
 0x235   :  { %v782_v34 = vmul.f32 1.442695, %v779_v31 }
 0x236   :  { %v335_v35 = vmul.f32 %v1099_v27, %v334_v32 }
 0x237   :  { %1100 = vpow2.f32 %v782_v34 }
 0x238   :  { %v336_v37 = vadd.f32 %v1099_v27, %v335_v35 }
 0x23a   :  { %v340_v39 = vsel %vm339_vm4, %v1099_v27, %v336_v37 }
 0x23b   :  { %v345_v42 = vsel %vm342_vm5, %v344_v38, %v340_v39 }
 0x23c   :  { %v505_v43 = vpop.permute.xlu1 %504  ;;  %v347_v44 = vmul.f32 %v1504_v55, %v345_v42 }
 0x23d   :  { %v1538_v45 = vpop.eup %1100  ;;  %525 = vmatpush.msrb.mxu3 %v505_v43 }
 0x23e   :  { %349 = vst.msk [vmem:[#allocation15 + $0x20] sm:$0xff] %vm247_vm1, %v347_v44  ;;  %1043 = vmatmul.msk.f32.vlgmr.msrb.gmra.mxu0 %vm247_vm1, %v347_v44  ;;  %v787_v46 = vsel %vm247_vm1, %v1538_v45, 0.0 }
 0x23f   :  { %788 = vadd.xlane.f32.xlu2 %v787_v46 }
 0x242   :  { %823 = vrot.lane.b32.xlu1 %v1493_v40, %s1359_s17 }
 0x245   :  { %690 = vrot.lane.b32.xlu0 %v1496_v41, %s1357_s6  ;;  %v665_v58 = vpop.permute.xlu0 %664 }
 0x24a   :  { %849 = vrot.lane.b32.xlu1 %v1496_v41, %s1359_s17 }
 0x257   :  { %531 = vrot.lane.b32.xlu2 %v1496_v41, %s1358_s16 }
 0x267   :  { %v314_v47 = vpop.xlane.xlu1 %313 }
 0x268   :  { %1102 = vrcp.f32 %v314_v47  ;;  %v329_v51 = vand.u32 2147483648, %v314_v47  ;;  %v327_v53 = vand.u32 2147483647, %v314_v47  ;;  %vm323_vm7 = vweird.f32 %v314_v47 }
 0x26a   :  { %v330_v40 = vor.u32 1.1754944e-38, %v329_v51  ;;  %vm328_vm9 = vcmp.eq.f32.partialorder %v327_v53, 8.507059e+37 }
 0x26e   :  { %v1103_v48 = vpop.eup %1102 }
 0x26f   :  { %v319_v49 = vmul.f32 %v1103_v48, %v314_v47  ;;  %vm324_vm6 = vweird.f32 %v1103_v48 }
 0x270   :  { %vm325_vm8 = vmor %vm323_vm7, %vm324_vm6 }
 0x271   :  { %v320_v50 = vsub.f32 1.0, %v319_v49 }
 0x273   :  { %v321_v52 = vmul.f32 %v1103_v48, %v320_v50 }
 0x275   :  { %v322_v54 = vadd.f32 %v1103_v48, %v321_v52 }
 0x277   :  { %v326_v55 = vsel %vm325_vm8, %v1103_v48, %v322_v54 }
 0x278   :  { %v331_v56 = vsel %vm328_vm9, %v330_v40, %v326_v55 }
 0x279   :  { %v346_v57 = vmul.f32 %v1513_v62, %v331_v56 }
 0x27b   :  { %348 = vst.msk [vmem:[#allocation15] sm:$0xff] %vm247_vm1, %v346_v57  ;;  %1042 = vmatmul.msk.f32.vlgmr.msra.gmra.mxu3 %vm247_vm1, %v346_v57 }
 0x27c   :  { %685 = vmatpush.msra.mxu3 %v665_v58 }
 0x293   :  { %v466_v41 = vpop.xlane.xlu2 %465 }
 0x294   :  { %1104 = vrcp.f32 %v466_v41  ;;  %v481_v2 = vand.u32 2147483648, %v466_v41  ;;  %v479_v3 = vand.u32 2147483647, %v466_v41  ;;  %vm475_vm11 = vweird.f32 %v466_v41 }
 0x296   :  { %v482_v9 = vor.u32 1.1754944e-38, %v481_v2  ;;  %vm480_vm13 = vcmp.eq.f32.partialorder %v479_v3, 8.507059e+37 }
 0x29a   :  { %v1105_v59 = vpop.eup %1104 }
 0x29b   :  { %v471_v60 = vmul.f32 %v1105_v59, %v466_v41  ;;  %vm476_vm10 = vweird.f32 %v1105_v59 }
 0x29c   :  { %v627_v61 = vpop.xlane.xlu1 %626  ;;  %vm477_vm12 = vmor %vm475_vm11, %vm476_vm10 }
 0x29d   :  { %1106 = vrcp.f32 %v627_v61  ;;  %v469_v63 = vpop.xlane.xlu2 %468  ;;  %v472_v0 = vsub.f32 1.0, %v471_v60  ;;  %v642_v18 = vand.u32 2147483648, %v627_v61  ;;  %v640_v22 = vand.u32 2147483647, %v627_v61 }
 0x29e   :  { %1108 = vrcp.f32 %v469_v63  ;;  %v495_v23 = vand.u32 2147483648, %v469_v63  ;;  %v493_v27 = vand.u32 2147483647, %v469_v63  ;;  %vm636_vm2 = vweird.f32 %v627_v61 }
 0x29f   :  { %v473_v1 = vmul.f32 %v1105_v59, %v472_v0  ;;  %v643_v31 = vor.u32 1.1754944e-38, %v642_v18  ;;  %vm489_vm4 = vweird.f32 %v469_v63  ;;  %vm641_vm5 = vcmp.eq.f32.partialorder %v640_v22, 8.507059e+37  ;;  %v909_v22 = vld [vmem:[#allocation13 + $0x10] sm:$0xff] }
 0x2a0   :  { %v496_v34 = vor.u32 1.1754944e-38, %v495_v23  ;;  %vm494_vm7 = vcmp.eq.f32.partialorder %v493_v27, 8.507059e+37  ;;  %v908_v23 = vld [vmem:[#allocation13 + $0x8] sm:$0xff] }
 0x2a1   :  { %v474_v62 = vadd.f32 %v1105_v59, %v473_v1 }
 0x2a3   :  { %v1107_v4 = vpop.eup %1106  ;;  %v478_v6 = vsel %vm477_vm12, %v1105_v59, %v474_v62 }
 0x2a4   :  { %v1109_v5 = vpop.eup %1108  ;;  %v632_v10 = vmul.f32 %v1107_v4, %v627_v61  ;;  %v786_v12 = vpop.xlane.xlu0 %785  ;;  %v483_v15 = vsel %vm480_vm13, %v482_v9, %v478_v6  ;;  %vm637_vm14 = vweird.f32 %v1107_v4 }
 0x2a5   :  { %v485_v13 = vmul.f32 %v1109_v5, %v469_v63  ;;  %1110 = vrcp.f32 %v786_v12  ;;  %v1555_v14 = vpop.xlane.xlu2 %629  ;;  %vm490_vm15 = vweird.f32 %v1109_v5  ;;  %v498_v28 = vmul.f32 %v1517_v7, %v483_v15  ;;  %vm638_vm3 = vmor %vm636_vm2, %vm637_vm14 }
 0x2a6   :  { %v633_v16 = vsub.f32 1.0, %v632_v10  ;;  %1112 = vrcp.f32 %v1555_v14  ;;  %vm491_vm6 = vmor %vm489_vm4, %vm490_vm15  ;;  %v801_v43 = vand.u32 2147483648, %v786_v12  ;;  %v799_v48 = vand.u32 2147483647, %v786_v12 }
 0x2a7   :  { %v486_v20 = vsub.f32 1.0, %v485_v13  ;;  %501 = vst.msk [vmem:[#allocation15 + $0x8] sm:$0xff] %vm247_vm1, %v498_v28  ;;  %1048 = vmatmul.msk.f32.vlgmr.msrb.gmra.mxu3 %vm247_vm1, %v498_v28  ;;  %vm795_vm9 = vweird.f32 %v786_v12  ;;  %v656_v50 = vand.u32 2147483648, %v1555_v14  ;;  %v654_v53 = vand.u32 2147483647, %v1555_v14 }
 0x2a8   :  { %v634_v21 = vmul.f32 %v1107_v4, %v633_v16  ;;  %vm800_vm12 = vcmp.eq.f32.partialorder %v799_v48, 8.507059e+37  ;;  %vm650_vm13 = vweird.f32 %v1555_v14 }
 0x2a9   :  { %v487_v26 = vmul.f32 %v1109_v5, %v486_v20  ;;  %v657_v57 = vor.u32 1.1754944e-38, %v656_v50  ;;  %vm655_vm15 = vcmp.eq.f32.partialorder %v654_v53, 8.507059e+37 }
 0x2aa   :  { %v635_v29 = vadd.f32 %v1107_v4, %v634_v21  ;;  %v910_v21 = vld [vmem:[#allocation13 + $0x18] sm:$0xff] }
 0x2ab   :  { %v1111_v30 = vpop.eup %1110  ;;  %v488_v32 = vadd.f32 %v1109_v5, %v487_v26  ;;  %929 = vmatpush.msra.mxu1 %v910_v21  ;;  %v907_v26 = vld [vmem:[#allocation13] sm:$0xff] }
 0x2ac   :  { %v639_v33 = vsel %vm638_vm3, %v1107_v4, %v635_v29  ;;  %v791_v35 = vmul.f32 %v1111_v30, %v786_v12  ;;  %v1113_v36 = vpop.eup %1112  ;;  %vm796_vm8 = vweird.f32 %v1111_v30 }
 0x2ad   :  { %v644_v37 = vsel %vm641_vm5, %v643_v31, %v639_v33  ;;  %v492_v38 = vsel %vm491_vm6, %v1109_v5, %v488_v32  ;;  %v646_v42 = vmul.f32 %v1113_v36, %v1555_v14  ;;  %vm651_vm10 = vweird.f32 %v1113_v36  ;;  %vm797_vm11 = vmor %vm795_vm9, %vm796_vm8  ;;  %930 = vmatpush.msra.mxu1 %v909_v22 }
 0x2ae   :  { %v497_v7 = vsel %vm494_vm7, %v496_v34, %v492_v38  ;;  %v792_v39 = vsub.f32 1.0, %v791_v35  ;;  %v659_v44 = vmul.f32 %v1521_v17, %v644_v37  ;;  %v802_v17 = vor.u32 1.1754944e-38, %v801_v43  ;;  %vm652_vm14 = vmor %vm650_vm13, %vm651_vm10 }
 0x2af   :  { %v499_v46 = vmul.f32 %v1523_v19, %v497_v7  ;;  %v647_v49 = vsub.f32 1.0, %v646_v42  ;;  %931 = vmatpush.msra.mxu1 %v908_v23  ;;  %vm901_vm6 = vcmask 130048   ;;  %vm904_vm7 = vcmask 195584  }
 0x2b0   :  { %v793_v47 = vmul.f32 %v1111_v30, %v792_v39  ;;  %662 = vst.msk [vmem:[#allocation15 + $0x10] sm:$0xff] %vm247_vm1, %v659_v44  ;;  %1054 = vmatmul.msk.f32.vlgmr.msra.gmra.mxu3 %vm247_vm1, %v659_v44 }
 0x2b1   :  { %v648_v52 = vmul.f32 %v1113_v36, %v647_v49  ;;  %502 = vst.msk [vmem:[#allocation15 + $0x28] sm:$0xff] %vm247_vm1, %v499_v46  ;;  %932 = vmatpush.msra.mxu1 %v907_v26 }
 0x2b2   :  { %v794_v51 = vadd.f32 %v1111_v30, %v793_v47  ;;  %v789_v54 = vpop.xlane.xlu2 %788 }
 0x2b3   :  { %1114 = vrcp.f32 %v789_v54  ;;  %v649_v40 = vadd.f32 %v1113_v36, %v648_v52  ;;  %v815_v62 = vand.u32 2147483648, %v789_v54  ;;  %v813_v4 = vand.u32 2147483647, %v789_v54 }
 0x2b4   :  { %v798_v19 = vsel %vm797_vm11, %v1111_v30, %v794_v51  ;;  %v824_v55 = vpop.permute.xlu1 %823  ;;  %vm809_vm3 = vweird.f32 %v789_v54 }
 0x2b5   :  { %v803_v56 = vsel %vm800_vm12, %v802_v17, %v798_v19  ;;  %844 = vmatpush.msrb.mxu3 %v824_v55  ;;  %v653_v58 = vsel %vm652_vm14, %v1113_v36, %v649_v40  ;;  %v816_v5 = vor.u32 1.1754944e-38, %v815_v62  ;;  %vm814_vm5 = vcmp.eq.f32.partialorder %v813_v4, 8.507059e+37 }
 0x2b6   :  { %v818_v41 = vmul.f32 %v1529_v24, %v803_v56  ;;  %v658_v59 = vsel %vm655_vm15, %v657_v57, %v653_v58 }
 0x2b7   :  { %v660_v60 = vmul.f32 %v1531_v25, %v658_v59  ;;  %v691_v2 = vpop.permute.xlu0 %690 }
 0x2b8   :  { %821 = vst.msk [vmem:[#allocation15 + $0x18] sm:$0xff] %vm247_vm1, %v818_v41  ;;  %1060 = vmatmul.msk.f32.vlgmr.msrb.gmra.mxu3 %vm247_vm1, %v818_v41 }
 0x2b9   :  { %v1115_v61 = vpop.eup %1114  ;;  %663 = vst.msk [vmem:[#allocation15 + $0x30] sm:$0xff] %vm247_vm1, %v660_v60 }
 0x2ba   :  { %v805_v63 = vmul.f32 %v1115_v61, %v789_v54  ;;  %v532_v0 = vpop.permute.xlu2 %531  ;;  %vm810_vm2 = vweird.f32 %v1115_v61 }
 0x2bb   :  { %552 = vmatpush.msra.mxu0 %v532_v0  ;;  %vm811_vm4 = vmor %vm809_vm3, %vm810_vm2  ;;  %v393_v14 = vpop.f32.mrf.mxu0 }
 0x2bc   :  { %v806_v1 = vsub.f32 1.0, %v805_v63  ;;  %v850_v3 = vpop.permute.xlu1 %849  ;;  %1049 = vmatmul.msk.f32.vlgmr.msra.gmra.mxu0 %vm247_vm1, %v499_v46 }
 0x2bd   :  { %711 = vmatpush.msrb.mxu0 %v691_v2 }
 0x2be   :  { %v807_v24 = vmul.f32 %v1115_v61, %v806_v1 }
 0x2bf   :  { %870 = vmatpush.msra.mxu0 %v850_v3 }
 0x2c0   :  { %v808_v25 = vadd.f32 %v1115_v61, %v807_v24 }
 0x2c2   :  { %v812_v6 = vsel %vm811_vm4, %v1115_v61, %v808_v25 }
 0x2c3   :  { %v817_v9 = vsel %vm814_vm5, %v816_v5, %v812_v6 }
 0x2c4   :  { %1055 = vmatmul.msk.f32.vlgmr.msrb.gmra.mxu0 %vm247_vm1, %v660_v60  ;;  %v819_v10 = vmul.f32 %v1538_v45, %v817_v9 }
 0x2c6   :  { %822 = vst.msk [vmem:[#allocation15 + $0x38] sm:$0xff] %vm247_vm1, %v819_v10 }
 0x2c7   :  { %1017 = dma.vmem_to_hbm [thread:$0]  %s1010_s19, 1024, %s1012_s22, [#allocation16], %s1349_s13, %s1349_s13, %s1350_s14  }
 0x2cc   :  { %1061 = vmatmul.msk.f32.vlgmr.msra.gmra.mxu0 %vm247_vm1, %v819_v10 }
 0x2fe   :  { %v370_v12 = vpop.f32.mrf.mxu3 }
 0x32a   :  { %v527_v13 = vpop.f32.mrf.mxu3 }
 0x32b   :  { %877 = vrot.lane.b32.xlu0 %v527_v13, %s1350_s14 }
 0x333   :  { %v687_v15 = vpop.f32.mrf.mxu3 }
 0x334   :  { %885 = vrot.lane.b32.xlu1 %v687_v15, %s1360_s18 }
 0x339   :  { %v554_v16 = vpop.f32.mrf.mxu0 }
 0x33a   :  { %879 = vrot.lane.b32.xlu2 %v554_v16, %s1350_s14 }
 0x33b   :  { %v846_v18 = vpop.f32.mrf.mxu3 }
 0x33c   :  { %893 = vrot.lane.b32.xlu0 %v846_v18, %s1361_s1 }
 0x341   :  { %v713_v20 = vpop.f32.mrf.mxu0 }
 0x342   :  { %887 = vrot.lane.b32.xlu1 %v713_v20, %s1360_s18 }
 0x349   :  { %v872_v45 = vpop.f32.mrf.mxu0 }
 0x34a   :  { %895 = vrot.lane.b32.xlu0 %v872_v45, %s1361_s1 }
 0x394   :  { %v880_v33 = vpop.permute.xlu2 %879 }
 0x395   :  { %v900_v35 = vsel %vm247_vm1, %v393_v14, %v880_v33 }
 0x39d   :  { %v878_v27 = vpop.permute.xlu0 %877 }
 0x39e   :  { %v899_v29 = vsel %vm247_vm1, %v370_v12, %v878_v27 }
 0x3a6   :  { %v886_v28 = vpop.permute.xlu1 %885 }
 0x3a7   :  { %v902_v30 = vsel %vm901_vm6, %v899_v29, %v886_v28 }
 0x3ae   :  { %v894_v31 = vpop.permute.xlu0 %893 }
 0x3af   :  { %v905_v32 = vsel %vm904_vm7, %v902_v30, %v894_v31 }
 0x3b0   :  { %1062 = vmatmul.msk.f32.vlgmr.msra.gmra.mxu1 %vm149_vm0, %v905_v32 }
 0x3b4   :  { %v888_v34 = vpop.permute.xlu1 %887 }
 0x3b5   :  { %v903_v36 = vsel %vm901_vm6, %v900_v35, %v888_v34 }
 0x3bc   :  { %v896_v37 = vpop.permute.xlu0 %895 }
 0x3bd   :  { %v906_v38 = vsel %vm904_vm7, %v903_v36, %v896_v37 }
 0x3be   :  { %1063 = vmatmul.msk.f32.gmra.mxu1 %vm149_vm0, %v906_v38 }
 0x42d   :  { %v934_v7 = vpop.f32.mrf.mxu1 }
 0x42e   :  { %v940_v39 = vadd.f32 %v934_v7, %v1451_v8 }
 0x430   :  { %v942_v42 = vsel %vm149_vm0, %v940_v39, 0.0  ;;  %v948_v43 = vmul.f32 %v940_v39, %v940_v39 }
 0x431   :  { %943 = vadd.xlane.f32.xlu2 %v942_v42 }
 0x432   :  { %v950_v44 = vsel %vm149_vm0, %v948_v43, 0.0 }
 0x433   :  { %951 = vadd.xlane.f32.xlu0 %v950_v44 }
 0x43b   :  { %v937_v46 = vpop.f32.mrf.mxu1 }
 0x43c   :  { %v941_v47 = vadd.f32 %v937_v46, %v1457_v11 }
 0x43e   :  { %v945_v48 = vsel %vm149_vm0, %v941_v47, 0.0  ;;  %v949_v49 = vmul.f32 %v941_v47, %v941_v47 }
 0x43f   :  { %946 = vadd.xlane.f32.xlu1 %v945_v48 }
 0x440   :  { %v953_v50 = vsel %vm149_vm0, %v949_v49, 0.0 }
 0x441   :  { %954 = vadd.xlane.f32.xlu2 %v953_v50 }
 0x4a4   :  { %v944_v8 = vpop.xlane.xlu2 %943 }
 0x4a5   :  { %v956_v11 = vmul.f32 0.03125, %v944_v8 }
 0x4a6   :  { %v952_v51 = vpop.xlane.xlu0 %951 }
 0x4a7   :  { %v960_v52 = vmul.f32 %v956_v11, %v956_v11  ;;  %v958_v53 = vmul.f32 0.03125, %v952_v51  ;;  %v964_v2 = vsub.f32 %v940_v39, %v956_v11 }
 0x4a9   :  { %v962_v54 = vsub.f32 %v958_v53, %v960_v52 }
 0x4ab   :  { %v966_v17 = vadd.f32 1e-05, %v962_v54 }
 0x4ad   :  { %1116 = vrsqrt.f32 %v966_v17  ;;  %vm974_vm8 = vweird.f32 %v966_v17 }
 0x4b2   :  { %v947_v19 = vpop.xlane.xlu1 %946 }
 0x4b3   :  { %v957_v40 = vmul.f32 0.03125, %v947_v19  ;;  %v1117_v58 = vpop.eup %1116 }
 0x4b4   :  { %v955_v55 = vpop.xlane.xlu2 %954  ;;  %v969_v41 = vmul.f32 %v1117_v58, %v966_v17  ;;  %vm975_vm1 = vweird.f32 %v1117_v58 }
 0x4b5   :  { %v961_v56 = vmul.f32 %v957_v40, %v957_v40  ;;  %v959_v57 = vmul.f32 0.03125, %v955_v55  ;;  %vm976_vm9 = vmor %vm974_vm8, %vm975_vm1  ;;  %v965_v10 = vsub.f32 %v941_v47, %v957_v40 }
 0x4b6   :  { %v970_v60 = vmul.f32 %v1117_v58, %v969_v41 }
 0x4b7   :  { %v963_v59 = vsub.f32 %v959_v57, %v961_v56 }
 0x4b8   :  { %v971_v63 = vmul.f32 0.5, %v970_v60 }
 0x4b9   :  { %v967_v61 = vadd.f32 1e-05, %v963_v59 }
 0x4ba   :  { %v972_v0 = vsub.f32 1.5, %v971_v63 }
 0x4bb   :  { %1118 = vrsqrt.f32 %v967_v61  ;;  %vm984_vm11 = vweird.f32 %v967_v61 }
 0x4bc   :  { %v973_v1 = vmul.f32 %v1117_v58, %v972_v0 }
 0x4be   :  { %v977_v62 = vsel %vm976_vm9, %v1117_v58, %v973_v1 }
 0x4bf   :  { %v988_v4 = vmul.f32 %v977_v62, %v964_v2 }
 0x4c1   :  { %v1119_v3 = vpop.eup %1118  ;;  %990 = vst.msk [vmem:[#allocation14] sm:$0xff] %vm149_vm0, %v988_v4 }
 0x4c2   :  { %v979_v24 = vmul.f32 %v1119_v3, %v967_v61  ;;  %vm985_vm10 = vweird.f32 %v1119_v3 }
 0x4c3   :  { %vm986_vm12 = vmor %vm984_vm11, %vm985_vm10 }
 0x4c4   :  { %v980_v25 = vmul.f32 %v1119_v3, %v979_v24 }
 0x4c6   :  { %v981_v5 = vmul.f32 0.5, %v980_v25 }
 0x4c8   :  { %v982_v6 = vsub.f32 1.5, %v981_v5 }
 0x4ca   :  { %v983_v9 = vmul.f32 %v1119_v3, %v982_v6 }
 0x4cc   :  { %v987_v12 = vsel %vm986_vm12, %v1119_v3, %v983_v9 }
 0x4cd   :  { %v989_v13 = vmul.f32 %v987_v12, %v965_v10 }
 0x4cf   :  { %991 = vst.msk [vmem:[#allocation14 + $0x8] sm:$0xff] %vm149_vm0, %v989_v13 }
 0x4d0   :  { %1004 = dma.vmem_to_hbm [thread:$0]  %s997_s23, 256, %s999_s25, [#allocation4], %s1349_s13, %s1349_s13, %s1350_s14  }
 0x4d1   :  { %1344 = dma.done.wait [#allocation4], 256  }
 0x4d2   :  { %1345 = vsyncadd [#allocation4], 4294967040 }
 0x4d3   :  { %1346 = dma.done.wait [#allocation16], 1024  }
 0x4d4   :  { %1347 = vsyncadd [#allocation16], 4294966272 }
 0x4d5   :  { %1026 = vsyncpa [#allocation3], 1 }
 0x4d6   :  { %1027 = vsyncpa [#allocation6], 1 }
 0x4d7   :  { %1028 = vsyncpa [#allocation9], 1 }
 0x4d8   :  { %1029 = vsyncpa [#allocation12], 1 }
 0x4d9   :  { %1030 = vsyncpa [#allocation4], 1 }
 0x4da   :  { %1031 = vsyncpa [#allocation16], 1 }

</bundles_post_ra>
